<compile_context>
chip_gen: v5e
topology: v5e:2x2
jax: 0.10.0
libtpu: 0.0.40
codegen_flags: <defaults>
</compile_context>

<pallas_src>
import math
import numpy as np
import jax
import jax.numpy as jnp
from jax import lax
from jax.experimental import pallas as pl
from jax.experimental.pallas import tpu as pltpu


# Gate column order of the reference module: [candidate(tanh), i, f, o].
# i/f/o pre-activations are synthesized at half scale (weight columns and bias * 0.5)
# so the recurrence needs only ONE full-width tanh per step.
GATE_PREACT_SCALE = (1.0, 0.5, 0.5, 0.5)
# A @ B.T on the MXU (rhs-transposed matmul), same dimension numbers as the official
# Pallas TPU flash-attention kernel.
NT_DIM_NUMBERS = (((1,), (1,)), ((), ()))


# -----------------------------------------------------------------------------
# Config / parameter setup (glue, plain numpy / JAX)
# -----------------------------------------------------------------------------
def get_double_dct_accumulate_config(in_dim, out_dim, sparsity):
    rf = 1.0 - sparsity
    medium_in = round(in_dim * math.sqrt(rf))
    medium_out = round(out_dim * math.sqrt(rf))
    small_in = round(medium_in * math.sqrt(rf))
    small_out = round(medium_out * math.sqrt(rf))
    return small_in, small_out, medium_in, medium_out


def dct_matrix(N):
    # Orthonormal DCT-II matrix D:  dct(x, norm='ortho') = D @ x ; idct(y) = D.T @ y
    n = np.arange(N)
    k = n[:, None]
    D = np.cos(np.pi * (2 * n[None, :] + 1) * k / (2.0 * N))
    scale = np.full((N, 1), np.sqrt(2.0 / N))
    scale[0, 0] = np.sqrt(1.0 / N)
    return (D * scale).astype(np.float32)


def dct2d(x, D_rows, D_cols):
    # torch_dct.dct_2d(x, norm='ortho') for x [R, C]
    return jnp.asarray(D_rows) @ x @ jnp.asarray(D_cols).T


def get_dct_init(key, dim_out, dim_in, med_out, med_in, small_out, small_in, D):
    # Deterministic replica of DoubleDctLSTM.get_dct_init (uniform init -> dct2d ->
    # top-left crop -> dct2d -> top-left crop).
    initrange = 1.0 / math.sqrt(dim_out)
    init = jax.random.uniform(key, (dim_out, dim_in), minval=-initrange,
                              maxval=initrange, dtype=jnp.float32)
    init_f = dct2d(init, D[dim_out], D[dim_in])
    med = init_f[:med_out, :med_in]
    med_f = dct2d(med, D[med_out], D[med_in])
    return med_f[:small_out, :small_in]


def build_dct_operators(cfg, D, dtype=np.float32):
    """Constant operators folding BOTH zero-padded IDCT stages of get_weights():

         W_gate = L @ C_gate @ R          (padding folded into L / R)
           L = D_O^T[:, :m_out] @ D_mout^T[:, :s_out]    (O, s_out)
           R = D_min[:s_in, :]  @ D_I[:m_in, :]          (s_in, I)

       The recurrence needs W^T:
         wx[:, g*H:(g+1)*H] = R^T @ C_g^T @ L^T
       All 4 gates are batched through a block-diagonal L^T, with the i/f/o 0.5
       pre-activation scale (sigmoid-via-tanh) folded into the per-gate blocks.
       Pure constants (depend only on the fixed DCT layers), built once with numpy.
    """
    (input_dim, hidden_dim,
     ih_s_in, ih_s_out, ih_m_in, ih_m_out,
     hh_s_in, hh_s_out, hh_m_in, hh_m_out) = cfg

    def lr(s_out, s_in, m_out, m_in, O, I):
        L = D[O].T[:, :m_out] @ D[m_out].T[:, :s_out]      # (O, s_out)
        R = D[m_in][:s_in, :] @ D[I][:m_in, :]             # (s_in, I)
        return L.astype(dtype), R.astype(dtype)

    def blkdiag4_scaled(Lt):
        # NOTE(perf, at-scale): this operator is 75% zeros; for large H replace the
        # single block-diag matmul with four per-gate dots.
        p, q = Lt.shape
        Z = np.zeros((4 * p, 4 * q), dtype)
        for g, s in enumerate(GATE_PREACT_SCALE):
            Z[g * p:(g + 1) * p, g * q:(g + 1) * q] = s * Lt
        return Z

    L_ih, R_ih = lr(ih_s_out, ih_s_in, ih_m_out, ih_m_in, hidden_dim, input_dim)
    L_hh, R_hh = lr(hh_s_out, hh_s_in, hh_m_out, hh_m_in, hidden_dim, hidden_dim)
    return dict(
        a_ih=jnp.asarray(R_ih.T),                     # (I, s_in_ih)
        bblk_ih=jnp.asarray(blkdiag4_scaled(L_ih.T)), # (4*s_out_ih, 4H), 0.5-folded
        a_hh=jnp.asarray(R_hh.T),                     # (H, s_in_hh)
        bblk_hh=jnp.asarray(blkdiag4_scaled(L_hh.T)), # (4*s_out_hh, 4H), 0.5-folded
    )


# -----------------------------------------------------------------------------
# Fused Pallas kernel: DCT weight synthesis (prologue) + full LSTM recurrence
# -----------------------------------------------------------------------------
def fused_lstm_kernel(xf_ref, cst_ih_ref, bblk_ih_ref, a_ih_ref,
                      cst_hh_ref, bblk_hh_ref, a_hh_ref, b_ref,
                      out_ref, h_last_ref, c_last_ref,
                      xw_scr):
    S, B, H = out_ref.shape
    H4 = 4 * H

    # ---- Prologue A: recurrent weights, all 4 gates in two lane-dense matmuls ----
    #   wh[:, g*H:(g+1)*H] = scale_g * R_hh^T @ C_hh[g]^T @ L_hh^T
    # (cst_hh holds the raw (4*s_out, s_in) gate-stacked coefficients; the rhs-T dot
    #  gives R^T @ C_g^T without any explicit transpose / relayout.)
    t_hh = lax.dot_general(a_hh_ref[...], cst_hh_ref[...], NT_DIM_NUMBERS,
                           preferred_element_type=jnp.float32)      # (H, 4*s_out_hh)
    wh = jnp.dot(t_hh, bblk_hh_ref[...],
                 preferred_element_type=jnp.float32)                # (H, 4H), vreg-resident

    # ---- Prologue B: input contribution for ALL timesteps, hoisted off the serial
    # path.  wx is never materialized:
    #   xw = ((x @ R_ih^T) @ C_ih_stack^T) @ blkdiag(scale_g * L_ih^T) + scale * bias
    lane_row = lax.broadcasted_iota(jnp.int32, (1, H4), 1)
    b_scaled = b_ref[...] * jnp.where(lane_row < H, 1.0, 0.5)       # 0.5 on i/f/o bias
    u = jnp.dot(xf_ref[...], a_ih_ref[...],
                preferred_element_type=jnp.float32)                 # (S*B, s_in_ih)
    v = lax.dot_general(u, cst_ih_ref[...], NT_DIM_NUMBERS,
                        preferred_element_type=jnp.float32)         # (S*B, 4*s_out_ih)
    xw_scr[...] = jnp.dot(v, bblk_ih_ref[...],
                          preferred_element_type=jnp.float32) + b_scaled

    # ---- Serial LSTM recurrence ----
    lane = lax.broadcasted_iota(jnp.int32, (B, H4), 1)
    tanh_mask = lane < H          # columns [0, H): candidate gate (unscaled)

    def step(t, carry):
        h, c = carry
        # NOTE(perf): wh is loop-invariant; if the bundle shows per-step RHS staging,
        # pin it in MXU weight regs via pltpu.matmul_push_rhs / matmul_acc_lhs / matmul_pop.
        gates = xw_scr[pl.ds(t * B, B), :] + jnp.dot(
            h, wh, preferred_element_type=jnp.float32)              # (B, 4H)
        # Single full-width EUP pass; sigmoid(z) = 0.5*tanh(z/2) + 0.5 on i/f/o lanes
        # (their pre-activations were synthesized at half scale).
        th = jnp.tanh(gates)
        act = jnp.where(tanh_mask, th, 0.5 * th + 0.5)
        # NOTE(perf): 32-lane sub-vreg extracts below lower to masked selects at H=32;
        # a pltpu.roll-based gate alignment is only worth it if the bundle shows
        # relayout copies here.
        g = act[:, 0:H]            # candidate (tanh)
        i = act[:, H:2 * H]        # input gate
        f = act[:, 2 * H:3 * H]    # forget gate
        o = act[:, 3 * H:4 * H]    # output gate
        c_new = i * g + f * c
        h_new = o * jnp.tanh(c_new)
        out_ref[t] = h_new         # VMEM store; single HBM writeback at kernel end
        return h_new, c_new

    zero = jnp.zeros((B, H), jnp.float32)
    # S=8: full unroll is fine.  For S in the hundreds, unroll in blocks of ~8 inside
    # an outer fori_loop to bound vreg pressure.
    h_fin, c_fin = lax.fori_loop(0, S, step, (zero, zero), unroll=True)
    h_last_ref[...] = h_fin        # written once, after the loop
    c_last_ref[...] = c_fin


def double_dct_lstm_forward(x, ih_coeffs, hh_coeffs, bias, cfg, ops):
    """Full DoubleDctLSTM forward: one fused pallas_call (weights + recurrence)."""
    (input_dim, hidden_dim,
     ih_s_in, ih_s_out, ih_m_in, ih_m_out,
     hh_s_in, hh_s_out, hh_m_in, hh_m_out) = cfg
    S, B, I = x.shape
    H = hidden_dim
    H4 = 4 * H

    # Free (contiguous) reshapes only — no transposes / relayout launches in the wrapper.
    xf = x.reshape(S * B, I)
    cst_ih = ih_coeffs.reshape(4 * ih_s_out, ih_s_in)   # row block g = C_ih[g]
    cst_hh = hh_coeffs.reshape(4 * hh_s_out, hh_s_in)
    bias_row = bias.reshape(1, H4)

    def full(shape):
        return pl.BlockSpec(shape, lambda i: (0,) * len(shape))

    # TODO(synk): weight_drop / dropout_dct (nn.Dropout) not implemented — the
    # reference configuration uses weight_drop=0.0, dropout_dct=False.
    out_seq, h_last, c_last = pl.pallas_call(
        fused_lstm_kernel,
        out_shape=(jax.ShapeDtypeStruct((S, B, H), jnp.float32),
                   jax.ShapeDtypeStruct((B, H), jnp.float32),
                   jax.ShapeDtypeStruct((B, H), jnp.float32)),
        grid_spec=pltpu.PrefetchScalarGridSpec(
            num_scalar_prefetch=0,
            grid=(1,),
            in_specs=[
                full((S * B, I)),
                full(tuple(cst_ih.shape)), full(tuple(ops["bblk_ih"].shape)),
                full(tuple(ops["a_ih"].shape)),
                full(tuple(cst_hh.shape)), full(tuple(ops["bblk_hh"].shape)),
                full(tuple(ops["a_hh"].shape)),
                full((1, H4)),
            ],
            out_specs=[full((S, B, H)), full((B, H)), full((B, H))],
            scratch_shapes=[pltpu.VMEM((S * B, H4), jnp.float32)],
        ),
        compiler_params=pltpu.CompilerParams(
            dimension_semantics=("arbitrary",)),
    )(xf, cst_ih, ops["bblk_ih"], ops["a_ih"],
      cst_hh, ops["bblk_hh"], ops["a_hh"], bias_row)

    # matches (op, hidden) == (stacked outputs, (h_T, c_T))
    return out_seq, (h_last, c_last)


# -----------------------------------------------------------------------------
# Pure-JAX reference (faithful to the torch math; for correctness check)
# -----------------------------------------------------------------------------
def reference_forward(x, ih_coeffs, hh_coeffs, bias, cfg, D):
    (input_dim, hidden_dim,
     ih_s_in, ih_s_out, ih_m_in, ih_m_out,
     hh_s_in, hh_s_out, hh_m_in, hh_m_out) = cfg

    def gen(coeffs4, s_out, s_in, m_out, m_in, O, I):
        P_med = jnp.zeros((4, m_out, m_in)).at[:, :s_out, :s_in].set(coeffs4)
        W_med = jnp.einsum('ab,gbc,cd->gad', D[m_out].T, P_med, D[m_in])
        P_big = jnp.zeros((4, O, I)).at[:, :m_out, :m_in].set(W_med)
        return jnp.einsum('ab,gbc,cd->gad', D[O].T, P_big, D[I])

    w_ih = gen(ih_coeffs, ih_s_out, ih_s_in, ih_m_out, ih_m_in,
               hidden_dim, input_dim).reshape(4 * hidden_dim, input_dim)
    w_hh = gen(hh_coeffs, hh_s_out, hh_s_in, hh_m_out, hh_m_in,
               hidden_dim, hidden_dim).reshape(4 * hidden_dim, hidden_dim)
    wx, wh = w_ih.T, w_hh.T
    H = hidden_dim
    B = x.shape[1]

    def step(carry, xt):
        h, c = carry
        gates = xt @ wx + h @ wh + bias[None, :]
        g = jnp.tanh(gates[:, 0:H])
        i = jax.nn.sigmoid(gates[:, H:2 * H])
        f = jax.nn.sigmoid(gates[:, 2 * H:3 * H])
        o = jax.nn.sigmoid(gates[:, 3 * H:4 * H])
        c_new = i * g + f * c
        h_new = o * jnp.tanh(c_new)
        return (h_new, c_new), h_new

    (h_T, c_T), ys = lax.scan(step, (jnp.zeros((B, H)), jnp.zeros((B, H))), x)
    return ys, (h_T, c_T)


# -----------------------------------------------------------------------------
if __name__ == "__main__":
    input_dim, hidden_dim = 48, 32
    sparsity_ih = sparsity_hh = 0.5
    seq, batch = 8, 4

    ih_s_in, ih_s_out, ih_m_in, ih_m_out = get_double_dct_accumulate_config(
        input_dim, hidden_dim, sparsity_ih)
    hh_s_in, hh_s_out, hh_m_in, hh_m_out = get_double_dct_accumulate_config(
        hidden_dim, hidden_dim, sparsity_hh)
    assert hh_s_out == hh_s_in == ih_s_out
    assert hh_m_in == hh_m_out == ih_m_out

    cfg = (input_dim, hidden_dim,
           ih_s_in, ih_s_out, ih_m_in, ih_m_out,
           hh_s_in, hh_s_out, hh_m_in, hh_m_out)

    sizes = {input_dim, hidden_dim, ih_m_in, ih_m_out, hh_m_in, hh_m_out}
    D = {n: dct_matrix(n) for n in sizes}
    ops = build_dct_operators(cfg, D)

    key = jax.random.PRNGKey(0)
    keys = jax.random.split(key, 10)
    ih_coeffs = jnp.stack([
        get_dct_init(keys[g], hidden_dim, input_dim,
                     ih_m_out, ih_m_in, ih_s_out, ih_s_in, D)
        for g in range(4)])                                      # (4, s_out, s_in)
    hh_coeffs = jnp.stack([
        get_dct_init(keys[4 + g], hidden_dim, hidden_dim,
                     hh_m_out, hh_m_in, hh_s_out, hh_s_in, D)
        for g in range(4)])
    initrange = 1.0 / math.sqrt(hidden_dim)
    bias = jax.random.uniform(keys[8], (4 * hidden_dim,), minval=-initrange,
                              maxval=initrange, dtype=jnp.float32)

    x = jax.random.normal(keys[9], (seq, batch, input_dim), dtype=jnp.float32)

    outputs, (h_last, c_last) = double_dct_lstm_forward(
        x, ih_coeffs, hh_coeffs, bias, cfg, ops)
    jax.block_until_ready((outputs, h_last, c_last))

    ref_out, (ref_h, ref_c) = reference_forward(
        x, ih_coeffs, hh_coeffs, bias, cfg, D)
    np.testing.assert_allclose(np.asarray(outputs), np.asarray(ref_out),
                               rtol=1e-4, atol=1e-4)
    np.testing.assert_allclose(np.asarray(c_last), np.asarray(ref_c),
                               rtol=1e-4, atol=1e-4)
    np.testing.assert_allclose(np.asarray(h_last), np.asarray(ref_h),
                               rtol=1e-4, atol=1e-4)

    print("KERNEL_OK")
</pallas_src>

<mosaic_0001>
module attributes {stable_mosaic.version = 11 : i64} {
  func.func @fused_lstm_kernel(%arg0: i32, %arg1: memref<32x48xf32, #tpu.memory_space<vmem>>, %arg2: memref<64x24xf32, #tpu.memory_space<vmem>>, %arg3: memref<64x128xf32, #tpu.memory_space<vmem>>, %arg4: memref<48x24xf32, #tpu.memory_space<vmem>>, %arg5: memref<64x16xf32, #tpu.memory_space<vmem>>, %arg6: memref<64x128xf32, #tpu.memory_space<vmem>>, %arg7: memref<32x16xf32, #tpu.memory_space<vmem>>, %arg8: memref<1x128xf32, #tpu.memory_space<vmem>>, %arg9: memref<8x4x32xf32, #tpu.memory_space<vmem>>, %arg10: memref<4x32xf32, #tpu.memory_space<vmem>>, %arg11: memref<4x32xf32, #tpu.memory_space<vmem>>, %arg12: memref<32x128xf32, #tpu.memory_space<vmem>>) attributes {dimension_semantics = [#tpu.dimension_semantics<arbitrary>], iteration_bounds = array<i64: 1>, scalar_prefetch = 0 : i64, scratch_operands = 1 : i64, tpu.core_type = #tpu.core_type<tc>, window_params = [{pipeline_mode = #tpu.pipeline_mode<synchronous>, transform_indices = @transform_0, window_bounds = array<i64: 32, 48>}, {pipeline_mode = #tpu.pipeline_mode<synchronous>, transform_indices = @transform_1, window_bounds = array<i64: 64, 24>}, {pipeline_mode = #tpu.pipeline_mode<synchronous>, transform_indices = @transform_2, window_bounds = array<i64: 64, 128>}, {pipeline_mode = #tpu.pipeline_mode<synchronous>, transform_indices = @transform_3, window_bounds = array<i64: 48, 24>}, {pipeline_mode = #tpu.pipeline_mode<synchronous>, transform_indices = @transform_4, window_bounds = array<i64: 64, 16>}, {pipeline_mode = #tpu.pipeline_mode<synchronous>, transform_indices = @transform_5, window_bounds = array<i64: 64, 128>}, {pipeline_mode = #tpu.pipeline_mode<synchronous>, transform_indices = @transform_6, window_bounds = array<i64: 32, 16>}, {pipeline_mode = #tpu.pipeline_mode<synchronous>, transform_indices = @transform_7, window_bounds = array<i64: 1, 128>}, {pipeline_mode = #tpu.pipeline_mode<synchronous>, transform_indices = @transform_8, window_bounds = array<i64: 8, 4, 32>}, {pipeline_mode = #tpu.pipeline_mode<synchronous>, transform_indices = @transform_9, window_bounds = array<i64: 4, 32>}, {pipeline_mode = #tpu.pipeline_mode<synchronous>, transform_indices = @transform_10, window_bounds = array<i64: 4, 32>}]} {
    %c0 = arith.constant 0 : index
    %c0_0 = arith.constant 0 : index
    %0 = vector.load %arg7[%c0, %c0_0] : memref<32x16xf32, #tpu.memory_space<vmem>>, vector<32x16xf32>
    %c0_1 = arith.constant 0 : index
    %c0_2 = arith.constant 0 : index
    %1 = vector.load %arg5[%c0_1, %c0_2] : memref<64x16xf32, #tpu.memory_space<vmem>>, vector<64x16xf32>
    %cst = arith.constant dense<0.000000e+00> : vector<32x64xf32>
    %2 = tpu.matmul %0, %1, %cst {dimension_numbers = #tpu.dot_dimension_numbers<[1], [1], [0], [0], [0, 0, 1, 0], [], []>} : vector<32x16xf32>, vector<64x16xf32>, vector<32x64xf32> -> vector<32x64xf32>
    %c0_3 = arith.constant 0 : index
    %c0_4 = arith.constant 0 : index
    %3 = vector.load %arg6[%c0_3, %c0_4] : memref<64x128xf32, #tpu.memory_space<vmem>>, vector<64x128xf32>
    %cst_5 = arith.constant dense<0.000000e+00> : vector<32x128xf32>
    %4 = tpu.matmul %2, %3, %cst_5 {dimension_numbers = #tpu.dot_dimension_numbers<[1], [0], [0], [1], [0, 0, 1, 1], [], []>} : vector<32x64xf32>, vector<64x128xf32>, vector<32x128xf32> -> vector<32x128xf32>
    %5 = tpu.iota {dimensions = array<i32: 1>} : vector<1x128xi32>
    %c0_6 = arith.constant 0 : index
    %c0_7 = arith.constant 0 : index
    %6 = vector.load %arg8[%c0_6, %c0_7] : memref<1x128xf32, #tpu.memory_space<vmem>>, vector<1x128xf32>
    %c32_i32 = arith.constant 32 : i32
    %7 = vector.broadcast %c32_i32 : i32 to vector<1x128xi32>
    %8 = arith.cmpi slt, %5, %7 : vector<1x128xi32>
    %cst_8 = arith.constant 1.000000e+00 : f32
    %cst_9 = arith.constant 5.000000e-01 : f32
    %9 = vector.broadcast %cst_8 : f32 to vector<1x128xf32>
    %10 = vector.broadcast %cst_9 : f32 to vector<1x128xf32>
    %11 = arith.select %8, %9, %10 : vector<1x128xi1>, vector<1x128xf32>
    %12 = arith.mulf %6, %11 : vector<1x128xf32>
    %c0_10 = arith.constant 0 : index
    %c0_11 = arith.constant 0 : index
    %13 = vector.load %arg1[%c0_10, %c0_11] : memref<32x48xf32, #tpu.memory_space<vmem>>, vector<32x48xf32>
    %c0_12 = arith.constant 0 : index
    %c0_13 = arith.constant 0 : index
    %14 = vector.load %arg4[%c0_12, %c0_13] : memref<48x24xf32, #tpu.memory_space<vmem>>, vector<48x24xf32>
    %cst_14 = arith.constant dense<0.000000e+00> : vector<32x24xf32>
    %15 = tpu.matmul %13, %14, %cst_14 {dimension_numbers = #tpu.dot_dimension_numbers<[1], [0], [0], [1], [0, 0, 1, 1], [], []>} : vector<32x48xf32>, vector<48x24xf32>, vector<32x24xf32> -> vector<32x24xf32>
    %c0_15 = arith.constant 0 : index
    %c0_16 = arith.constant 0 : index
    %16 = vector.load %arg2[%c0_15, %c0_16] : memref<64x24xf32, #tpu.memory_space<vmem>>, vector<64x24xf32>
    %cst_17 = arith.constant dense<0.000000e+00> : vector<32x64xf32>
    %17 = tpu.matmul %15, %16, %cst_17 {dimension_numbers = #tpu.dot_dimension_numbers<[1], [1], [0], [0], [0, 0, 1, 0], [], []>} : vector<32x24xf32>, vector<64x24xf32>, vector<32x64xf32> -> vector<32x64xf32>
    %c0_18 = arith.constant 0 : index
    %c0_19 = arith.constant 0 : index
    %18 = vector.load %arg3[%c0_18, %c0_19] : memref<64x128xf32, #tpu.memory_space<vmem>>, vector<64x128xf32>
    %cst_20 = arith.constant dense<0.000000e+00> : vector<32x128xf32>
    %19 = tpu.matmul %17, %18, %cst_20 {dimension_numbers = #tpu.dot_dimension_numbers<[1], [0], [0], [1], [0, 0, 1, 1], [], []>} : vector<32x64xf32>, vector<64x128xf32>, vector<32x128xf32> -> vector<32x128xf32>
    %20 = vector.broadcast %12 : vector<1x128xf32> to vector<32x128xf32>
    %21 = arith.addf %19, %20 : vector<32x128xf32>
    %c0_21 = arith.constant 0 : index
    %c0_22 = arith.constant 0 : index
    %22 = vector.load %arg12[%c0_21, %c0_22] : memref<32x128xf32, #tpu.memory_space<vmem>>, vector<32x128xf32>
    tpu.vector_store %arg12[%c0_21, %c0_22], %21 {strides = array<i32>} : memref<32x128xf32, #tpu.memory_space<vmem>>, vector<32x128xf32>,
    %23 = tpu.iota {dimensions = array<i32: 1>} : vector<4x128xi32>
    %c32_i32_23 = arith.constant 32 : i32
    %24 = vector.broadcast %c32_i32_23 : i32 to vector<4x128xi32>
    %25 = arith.cmpi slt, %23, %24 : vector<4x128xi32>
    %cst_24 = arith.constant 0.000000e+00 : f32
    %26 = vector.broadcast %cst_24 : f32 to vector<4x32xf32>
    %c0_i32 = arith.constant 0 : i32
    %c4_i32 = arith.constant 4 : i32
    %27 = arith.muli %c0_i32, %c4_i32 : i32
    %28 = arith.index_cast %27 : i32 to index
    %c0_25 = arith.constant 0 : index
    %29 = vector.load %arg12[%28, %c0_25] : memref<32x128xf32, #tpu.memory_space<vmem>>, vector<4x128xf32>
    %cst_26 = arith.constant dense<0.000000e+00> : vector<4x128xf32>
    %30 = tpu.matmul %26, %4, %cst_26 {dimension_numbers = #tpu.dot_dimension_numbers<[1], [0], [0], [1], [0, 0, 1, 1], [], []>} : vector<4x32xf32>, vector<32x128xf32>, vector<4x128xf32> -> vector<4x128xf32>
    %31 = arith.addf %29, %30 : vector<4x128xf32>
    %32 = math.tanh %31 : vector<4x128xf32>
    %cst_27 = arith.constant 5.000000e-01 : f32
    %33 = vector.broadcast %cst_27 : f32 to vector<4x128xf32>
    %34 = arith.mulf %33, %32 : vector<4x128xf32>
    %cst_28 = arith.constant 5.000000e-01 : f32
    %35 = vector.broadcast %cst_28 : f32 to vector<4x128xf32>
    %36 = arith.addf %34, %35 : vector<4x128xf32>
    %37 = arith.select %25, %32, %36 : vector<4x128xi1>, vector<4x128xf32>
    %38 = vector.extract_strided_slice %37 {offsets = [0, 0], sizes = [4, 32], strides = [1, 1]} : vector<4x128xf32> to vector<4x32xf32>
    %39 = vector.extract_strided_slice %37 {offsets = [0, 32], sizes = [4, 32], strides = [1, 1]} : vector<4x128xf32> to vector<4x32xf32>
    %40 = vector.extract_strided_slice %37 {offsets = [0, 64], sizes = [4, 32], strides = [1, 1]} : vector<4x128xf32> to vector<4x32xf32>
    %41 = vector.extract_strided_slice %37 {offsets = [0, 96], sizes = [4, 32], strides = [1, 1]} : vector<4x128xf32> to vector<4x32xf32>
    %42 = arith.mulf %39, %38 : vector<4x32xf32>
    %43 = arith.mulf %40, %26 : vector<4x32xf32>
    %44 = arith.addf %42, %43 : vector<4x32xf32>
    %45 = math.tanh %44 : vector<4x32xf32>
    %46 = arith.mulf %41, %45 : vector<4x32xf32>
    %47 = arith.index_cast %c0_i32 : i32 to index
    %c0_29 = arith.constant 0 : index
    %c0_30 = arith.constant 0 : index
    %48 = vector.load %arg9[%47, %c0_29, %c0_30] : memref<8x4x32xf32, #tpu.memory_space<vmem>>, vector<1x4x32xf32>
    %49 = vector.shape_cast %48 : vector<1x4x32xf32> to vector<4x32xf32>
    %50 = vector.shape_cast %46 : vector<4x32xf32> to vector<1x4x32xf32>
    tpu.vector_store %arg9[%47, %c0_29, %c0_30], %50 {strides = array<i32>} : memref<8x4x32xf32, #tpu.memory_space<vmem>>, vector<1x4x32xf32>,
    %c1_i32 = arith.constant 1 : i32
    %c4_i32_31 = arith.constant 4 : i32
    %51 = arith.muli %c1_i32, %c4_i32_31 : i32
    %52 = arith.index_cast %51 : i32 to index
    %c0_32 = arith.constant 0 : index
    %53 = vector.load %arg12[%52, %c0_32] : memref<32x128xf32, #tpu.memory_space<vmem>>, vector<4x128xf32>
    %cst_33 = arith.constant dense<0.000000e+00> : vector<4x128xf32>
    %54 = tpu.matmul %46, %4, %cst_33 {dimension_numbers = #tpu.dot_dimension_numbers<[1], [0], [0], [1], [0, 0, 1, 1], [], []>} : vector<4x32xf32>, vector<32x128xf32>, vector<4x128xf32> -> vector<4x128xf32>
    %55 = arith.addf %53, %54 : vector<4x128xf32>
    %56 = math.tanh %55 : vector<4x128xf32>
    %cst_34 = arith.constant 5.000000e-01 : f32
    %57 = vector.broadcast %cst_34 : f32 to vector<4x128xf32>
    %58 = arith.mulf %57, %56 : vector<4x128xf32>
    %cst_35 = arith.constant 5.000000e-01 : f32
    %59 = vector.broadcast %cst_35 : f32 to vector<4x128xf32>
    %60 = arith.addf %58, %59 : vector<4x128xf32>
    %61 = arith.select %25, %56, %60 : vector<4x128xi1>, vector<4x128xf32>
    %62 = vector.extract_strided_slice %61 {offsets = [0, 0], sizes = [4, 32], strides = [1, 1]} : vector<4x128xf32> to vector<4x32xf32>
    %63 = vector.extract_strided_slice %61 {offsets = [0, 32], sizes = [4, 32], strides = [1, 1]} : vector<4x128xf32> to vector<4x32xf32>
    %64 = vector.extract_strided_slice %61 {offsets = [0, 64], sizes = [4, 32], strides = [1, 1]} : vector<4x128xf32> to vector<4x32xf32>
    %65 = vector.extract_strided_slice %61 {offsets = [0, 96], sizes = [4, 32], strides = [1, 1]} : vector<4x128xf32> to vector<4x32xf32>
    %66 = arith.mulf %63, %62 : vector<4x32xf32>
    %67 = arith.mulf %64, %44 : vector<4x32xf32>
    %68 = arith.addf %66, %67 : vector<4x32xf32>
    %69 = math.tanh %68 : vector<4x32xf32>
    %70 = arith.mulf %65, %69 : vector<4x32xf32>
    %71 = arith.index_cast %c1_i32 : i32 to index
    %c0_36 = arith.constant 0 : index
    %c0_37 = arith.constant 0 : index
    %72 = vector.load %arg9[%71, %c0_36, %c0_37] : memref<8x4x32xf32, #tpu.memory_space<vmem>>, vector<1x4x32xf32>
    %73 = vector.shape_cast %72 : vector<1x4x32xf32> to vector<4x32xf32>
    %74 = vector.shape_cast %70 : vector<4x32xf32> to vector<1x4x32xf32>
    tpu.vector_store %arg9[%71, %c0_36, %c0_37], %74 {strides = array<i32>} : memref<8x4x32xf32, #tpu.memory_space<vmem>>, vector<1x4x32xf32>,
    %c2_i32 = arith.constant 2 : i32
    %c4_i32_38 = arith.constant 4 : i32
    %75 = arith.muli %c2_i32, %c4_i32_38 : i32
    %76 = arith.index_cast %75 : i32 to index
    %c0_39 = arith.constant 0 : index
    %77 = vector.load %arg12[%76, %c0_39] : memref<32x128xf32, #tpu.memory_space<vmem>>, vector<4x128xf32>
    %cst_40 = arith.constant dense<0.000000e+00> : vector<4x128xf32>
    %78 = tpu.matmul %70, %4, %cst_40 {dimension_numbers = #tpu.dot_dimension_numbers<[1], [0], [0], [1], [0, 0, 1, 1], [], []>} : vector<4x32xf32>, vector<32x128xf32>, vector<4x128xf32> -> vector<4x128xf32>
    %79 = arith.addf %77, %78 : vector<4x128xf32>
    %80 = math.tanh %79 : vector<4x128xf32>
    %cst_41 = arith.constant 5.000000e-01 : f32
    %81 = vector.broadcast %cst_41 : f32 to vector<4x128xf32>
    %82 = arith.mulf %81, %80 : vector<4x128xf32>
    %cst_42 = arith.constant 5.000000e-01 : f32
    %83 = vector.broadcast %cst_42 : f32 to vector<4x128xf32>
    %84 = arith.addf %82, %83 : vector<4x128xf32>
    %85 = arith.select %25, %80, %84 : vector<4x128xi1>, vector<4x128xf32>
    %86 = vector.extract_strided_slice %85 {offsets = [0, 0], sizes = [4, 32], strides = [1, 1]} : vector<4x128xf32> to vector<4x32xf32>
    %87 = vector.extract_strided_slice %85 {offsets = [0, 32], sizes = [4, 32], strides = [1, 1]} : vector<4x128xf32> to vector<4x32xf32>
    %88 = vector.extract_strided_slice %85 {offsets = [0, 64], sizes = [4, 32], strides = [1, 1]} : vector<4x128xf32> to vector<4x32xf32>
    %89 = vector.extract_strided_slice %85 {offsets = [0, 96], sizes = [4, 32], strides = [1, 1]} : vector<4x128xf32> to vector<4x32xf32>
    %90 = arith.mulf %87, %86 : vector<4x32xf32>
    %91 = arith.mulf %88, %68 : vector<4x32xf32>
    %92 = arith.addf %90, %91 : vector<4x32xf32>
    %93 = math.tanh %92 : vector<4x32xf32>
    %94 = arith.mulf %89, %93 : vector<4x32xf32>
    %95 = arith.index_cast %c2_i32 : i32 to index
    %c0_43 = arith.constant 0 : index
    %c0_44 = arith.constant 0 : index
    %96 = vector.load %arg9[%95, %c0_43, %c0_44] : memref<8x4x32xf32, #tpu.memory_space<vmem>>, vector<1x4x32xf32>
    %97 = vector.shape_cast %96 : vector<1x4x32xf32> to vector<4x32xf32>
    %98 = vector.shape_cast %94 : vector<4x32xf32> to vector<1x4x32xf32>
    tpu.vector_store %arg9[%95, %c0_43, %c0_44], %98 {strides = array<i32>} : memref<8x4x32xf32, #tpu.memory_space<vmem>>, vector<1x4x32xf32>,
    %c3_i32 = arith.constant 3 : i32
    %c4_i32_45 = arith.constant 4 : i32
    %99 = arith.muli %c3_i32, %c4_i32_45 : i32
    %100 = arith.index_cast %99 : i32 to index
    %c0_46 = arith.constant 0 : index
    %101 = vector.load %arg12[%100, %c0_46] : memref<32x128xf32, #tpu.memory_space<vmem>>, vector<4x128xf32>
    %cst_47 = arith.constant dense<0.000000e+00> : vector<4x128xf32>
    %102 = tpu.matmul %94, %4, %cst_47 {dimension_numbers = #tpu.dot_dimension_numbers<[1], [0], [0], [1], [0, 0, 1, 1], [], []>} : vector<4x32xf32>, vector<32x128xf32>, vector<4x128xf32> -> vector<4x128xf32>
    %103 = arith.addf %101, %102 : vector<4x128xf32>
    %104 = math.tanh %103 : vector<4x128xf32>
    %cst_48 = arith.constant 5.000000e-01 : f32
    %105 = vector.broadcast %cst_48 : f32 to vector<4x128xf32>
    %106 = arith.mulf %105, %104 : vector<4x128xf32>
    %cst_49 = arith.constant 5.000000e-01 : f32
    %107 = vector.broadcast %cst_49 : f32 to vector<4x128xf32>
    %108 = arith.addf %106, %107 : vector<4x128xf32>
    %109 = arith.select %25, %104, %108 : vector<4x128xi1>, vector<4x128xf32>
    %110 = vector.extract_strided_slice %109 {offsets = [0, 0], sizes = [4, 32], strides = [1, 1]} : vector<4x128xf32> to vector<4x32xf32>
    %111 = vector.extract_strided_slice %109 {offsets = [0, 32], sizes = [4, 32], strides = [1, 1]} : vector<4x128xf32> to vector<4x32xf32>
    %112 = vector.extract_strided_slice %109 {offsets = [0, 64], sizes = [4, 32], strides = [1, 1]} : vector<4x128xf32> to vector<4x32xf32>
    %113 = vector.extract_strided_slice %109 {offsets = [0, 96], sizes = [4, 32], strides = [1, 1]} : vector<4x128xf32> to vector<4x32xf32>
    %114 = arith.mulf %111, %110 : vector<4x32xf32>
    %115 = arith.mulf %112, %92 : vector<4x32xf32>
    %116 = arith.addf %114, %115 : vector<4x32xf32>
    %117 = math.tanh %116 : vector<4x32xf32>
    %118 = arith.mulf %113, %117 : vector<4x32xf32>
    %119 = arith.index_cast %c3_i32 : i32 to index
    %c0_50 = arith.constant 0 : index
    %c0_51 = arith.constant 0 : index
    %120 = vector.load %arg9[%119, %c0_50, %c0_51] : memref<8x4x32xf32, #tpu.memory_space<vmem>>, vector<1x4x32xf32>
    %121 = vector.shape_cast %120 : vector<1x4x32xf32> to vector<4x32xf32>
    %122 = vector.shape_cast %118 : vector<4x32xf32> to vector<1x4x32xf32>
    tpu.vector_store %arg9[%119, %c0_50, %c0_51], %122 {strides = array<i32>} : memref<8x4x32xf32, #tpu.memory_space<vmem>>, vector<1x4x32xf32>,
    %c4_i32_52 = arith.constant 4 : i32
    %c4_i32_53 = arith.constant 4 : i32
    %123 = arith.muli %c4_i32_52, %c4_i32_53 : i32
    %124 = arith.index_cast %123 : i32 to index
    %c0_54 = arith.constant 0 : index
    %125 = vector.load %arg12[%124, %c0_54] : memref<32x128xf32, #tpu.memory_space<vmem>>, vector<4x128xf32>
    %cst_55 = arith.constant dense<0.000000e+00> : vector<4x128xf32>
    %126 = tpu.matmul %118, %4, %cst_55 {dimension_numbers = #tpu.dot_dimension_numbers<[1], [0], [0], [1], [0, 0, 1, 1], [], []>} : vector<4x32xf32>, vector<32x128xf32>, vector<4x128xf32> -> vector<4x128xf32>
    %127 = arith.addf %125, %126 : vector<4x128xf32>
    %128 = math.tanh %127 : vector<4x128xf32>
    %cst_56 = arith.constant 5.000000e-01 : f32
    %129 = vector.broadcast %cst_56 : f32 to vector<4x128xf32>
    %130 = arith.mulf %129, %128 : vector<4x128xf32>
    %cst_57 = arith.constant 5.000000e-01 : f32
    %131 = vector.broadcast %cst_57 : f32 to vector<4x128xf32>
    %132 = arith.addf %130, %131 : vector<4x128xf32>
    %133 = arith.select %25, %128, %132 : vector<4x128xi1>, vector<4x128xf32>
    %134 = vector.extract_strided_slice %133 {offsets = [0, 0], sizes = [4, 32], strides = [1, 1]} : vector<4x128xf32> to vector<4x32xf32>
    %135 = vector.extract_strided_slice %133 {offsets = [0, 32], sizes = [4, 32], strides = [1, 1]} : vector<4x128xf32> to vector<4x32xf32>
    %136 = vector.extract_strided_slice %133 {offsets = [0, 64], sizes = [4, 32], strides = [1, 1]} : vector<4x128xf32> to vector<4x32xf32>
    %137 = vector.extract_strided_slice %133 {offsets = [0, 96], sizes = [4, 32], strides = [1, 1]} : vector<4x128xf32> to vector<4x32xf32>
    %138 = arith.mulf %135, %134 : vector<4x32xf32>
    %139 = arith.mulf %136, %116 : vector<4x32xf32>
    %140 = arith.addf %138, %139 : vector<4x32xf32>
    %141 = math.tanh %140 : vector<4x32xf32>
    %142 = arith.mulf %137, %141 : vector<4x32xf32>
    %143 = arith.index_cast %c4_i32_52 : i32 to index
    %c0_58 = arith.constant 0 : index
    %c0_59 = arith.constant 0 : index
    %144 = vector.load %arg9[%143, %c0_58, %c0_59] : memref<8x4x32xf32, #tpu.memory_space<vmem>>, vector<1x4x32xf32>
    %145 = vector.shape_cast %144 : vector<1x4x32xf32> to vector<4x32xf32>
    %146 = vector.shape_cast %142 : vector<4x32xf32> to vector<1x4x32xf32>
    tpu.vector_store %arg9[%143, %c0_58, %c0_59], %146 {strides = array<i32>} : memref<8x4x32xf32, #tpu.memory_space<vmem>>, vector<1x4x32xf32>,
    %c5_i32 = arith.constant 5 : i32
    %c4_i32_60 = arith.constant 4 : i32
    %147 = arith.muli %c5_i32, %c4_i32_60 : i32
    %148 = arith.index_cast %147 : i32 to index
    %c0_61 = arith.constant 0 : index
    %149 = vector.load %arg12[%148, %c0_61] : memref<32x128xf32, #tpu.memory_space<vmem>>, vector<4x128xf32>
    %cst_62 = arith.constant dense<0.000000e+00> : vector<4x128xf32>
    %150 = tpu.matmul %142, %4, %cst_62 {dimension_numbers = #tpu.dot_dimension_numbers<[1], [0], [0], [1], [0, 0, 1, 1], [], []>} : vector<4x32xf32>, vector<32x128xf32>, vector<4x128xf32> -> vector<4x128xf32>
    %151 = arith.addf %149, %150 : vector<4x128xf32>
    %152 = math.tanh %151 : vector<4x128xf32>
    %cst_63 = arith.constant 5.000000e-01 : f32
    %153 = vector.broadcast %cst_63 : f32 to vector<4x128xf32>
    %154 = arith.mulf %153, %152 : vector<4x128xf32>
    %cst_64 = arith.constant 5.000000e-01 : f32
    %155 = vector.broadcast %cst_64 : f32 to vector<4x128xf32>
    %156 = arith.addf %154, %155 : vector<4x128xf32>
    %157 = arith.select %25, %152, %156 : vector<4x128xi1>, vector<4x128xf32>
    %158 = vector.extract_strided_slice %157 {offsets = [0, 0], sizes = [4, 32], strides = [1, 1]} : vector<4x128xf32> to vector<4x32xf32>
    %159 = vector.extract_strided_slice %157 {offsets = [0, 32], sizes = [4, 32], strides = [1, 1]} : vector<4x128xf32> to vector<4x32xf32>
    %160 = vector.extract_strided_slice %157 {offsets = [0, 64], sizes = [4, 32], strides = [1, 1]} : vector<4x128xf32> to vector<4x32xf32>
    %161 = vector.extract_strided_slice %157 {offsets = [0, 96], sizes = [4, 32], strides = [1, 1]} : vector<4x128xf32> to vector<4x32xf32>
    %162 = arith.mulf %159, %158 : vector<4x32xf32>
    %163 = arith.mulf %160, %140 : vector<4x32xf32>
    %164 = arith.addf %162, %163 : vector<4x32xf32>
    %165 = math.tanh %164 : vector<4x32xf32>
    %166 = arith.mulf %161, %165 : vector<4x32xf32>
    %167 = arith.index_cast %c5_i32 : i32 to index
    %c0_65 = arith.constant 0 : index
    %c0_66 = arith.constant 0 : index
    %168 = vector.load %arg9[%167, %c0_65, %c0_66] : memref<8x4x32xf32, #tpu.memory_space<vmem>>, vector<1x4x32xf32>
    %169 = vector.shape_cast %168 : vector<1x4x32xf32> to vector<4x32xf32>
    %170 = vector.shape_cast %166 : vector<4x32xf32> to vector<1x4x32xf32>
    tpu.vector_store %arg9[%167, %c0_65, %c0_66], %170 {strides = array<i32>} : memref<8x4x32xf32, #tpu.memory_space<vmem>>, vector<1x4x32xf32>,
    %c6_i32 = arith.constant 6 : i32
    %c4_i32_67 = arith.constant 4 : i32
    %171 = arith.muli %c6_i32, %c4_i32_67 : i32
    %172 = arith.index_cast %171 : i32 to index
    %c0_68 = arith.constant 0 : index
    %173 = vector.load %arg12[%172, %c0_68] : memref<32x128xf32, #tpu.memory_space<vmem>>, vector<4x128xf32>
    %cst_69 = arith.constant dense<0.000000e+00> : vector<4x128xf32>
    %174 = tpu.matmul %166, %4, %cst_69 {dimension_numbers = #tpu.dot_dimension_numbers<[1], [0], [0], [1], [0, 0, 1, 1], [], []>} : vector<4x32xf32>, vector<32x128xf32>, vector<4x128xf32> -> vector<4x128xf32>
    %175 = arith.addf %173, %174 : vector<4x128xf32>
    %176 = math.tanh %175 : vector<4x128xf32>
    %cst_70 = arith.constant 5.000000e-01 : f32
    %177 = vector.broadcast %cst_70 : f32 to vector<4x128xf32>
    %178 = arith.mulf %177, %176 : vector<4x128xf32>
    %cst_71 = arith.constant 5.000000e-01 : f32
    %179 = vector.broadcast %cst_71 : f32 to vector<4x128xf32>
    %180 = arith.addf %178, %179 : vector<4x128xf32>
    %181 = arith.select %25, %176, %180 : vector<4x128xi1>, vector<4x128xf32>
    %182 = vector.extract_strided_slice %181 {offsets = [0, 0], sizes = [4, 32], strides = [1, 1]} : vector<4x128xf32> to vector<4x32xf32>
    %183 = vector.extract_strided_slice %181 {offsets = [0, 32], sizes = [4, 32], strides = [1, 1]} : vector<4x128xf32> to vector<4x32xf32>
    %184 = vector.extract_strided_slice %181 {offsets = [0, 64], sizes = [4, 32], strides = [1, 1]} : vector<4x128xf32> to vector<4x32xf32>
    %185 = vector.extract_strided_slice %181 {offsets = [0, 96], sizes = [4, 32], strides = [1, 1]} : vector<4x128xf32> to vector<4x32xf32>
    %186 = arith.mulf %183, %182 : vector<4x32xf32>
    %187 = arith.mulf %184, %164 : vector<4x32xf32>
    %188 = arith.addf %186, %187 : vector<4x32xf32>
    %189 = math.tanh %188 : vector<4x32xf32>
    %190 = arith.mulf %185, %189 : vector<4x32xf32>
    %191 = arith.index_cast %c6_i32 : i32 to index
    %c0_72 = arith.constant 0 : index
    %c0_73 = arith.constant 0 : index
    %192 = vector.load %arg9[%191, %c0_72, %c0_73] : memref<8x4x32xf32, #tpu.memory_space<vmem>>, vector<1x4x32xf32>
    %193 = vector.shape_cast %192 : vector<1x4x32xf32> to vector<4x32xf32>
    %194 = vector.shape_cast %190 : vector<4x32xf32> to vector<1x4x32xf32>
    tpu.vector_store %arg9[%191, %c0_72, %c0_73], %194 {strides = array<i32>} : memref<8x4x32xf32, #tpu.memory_space<vmem>>, vector<1x4x32xf32>,
    %c7_i32 = arith.constant 7 : i32
    %c4_i32_74 = arith.constant 4 : i32
    %195 = arith.muli %c7_i32, %c4_i32_74 : i32
    %196 = arith.index_cast %195 : i32 to index
    %c0_75 = arith.constant 0 : index
    %197 = vector.load %arg12[%196, %c0_75] : memref<32x128xf32, #tpu.memory_space<vmem>>, vector<4x128xf32>
    %cst_76 = arith.constant dense<0.000000e+00> : vector<4x128xf32>
    %198 = tpu.matmul %190, %4, %cst_76 {dimension_numbers = #tpu.dot_dimension_numbers<[1], [0], [0], [1], [0, 0, 1, 1], [], []>} : vector<4x32xf32>, vector<32x128xf32>, vector<4x128xf32> -> vector<4x128xf32>
    %199 = arith.addf %197, %198 : vector<4x128xf32>
    %200 = math.tanh %199 : vector<4x128xf32>
    %cst_77 = arith.constant 5.000000e-01 : f32
    %201 = vector.broadcast %cst_77 : f32 to vector<4x128xf32>
    %202 = arith.mulf %201, %200 : vector<4x128xf32>
    %cst_78 = arith.constant 5.000000e-01 : f32
    %203 = vector.broadcast %cst_78 : f32 to vector<4x128xf32>
    %204 = arith.addf %202, %203 : vector<4x128xf32>
    %205 = arith.select %25, %200, %204 : vector<4x128xi1>, vector<4x128xf32>
    %206 = vector.extract_strided_slice %205 {offsets = [0, 0], sizes = [4, 32], strides = [1, 1]} : vector<4x128xf32> to vector<4x32xf32>
    %207 = vector.extract_strided_slice %205 {offsets = [0, 32], sizes = [4, 32], strides = [1, 1]} : vector<4x128xf32> to vector<4x32xf32>
    %208 = vector.extract_strided_slice %205 {offsets = [0, 64], sizes = [4, 32], strides = [1, 1]} : vector<4x128xf32> to vector<4x32xf32>
    %209 = vector.extract_strided_slice %205 {offsets = [0, 96], sizes = [4, 32], strides = [1, 1]} : vector<4x128xf32> to vector<4x32xf32>
    %210 = arith.mulf %207, %206 : vector<4x32xf32>
    %211 = arith.mulf %208, %188 : vector<4x32xf32>
    %212 = arith.addf %210, %211 : vector<4x32xf32>
    %213 = math.tanh %212 : vector<4x32xf32>
    %214 = arith.mulf %209, %213 : vector<4x32xf32>
    %215 = arith.index_cast %c7_i32 : i32 to index
    %c0_79 = arith.constant 0 : index
    %c0_80 = arith.constant 0 : index
    %216 = vector.load %arg9[%215, %c0_79, %c0_80] : memref<8x4x32xf32, #tpu.memory_space<vmem>>, vector<1x4x32xf32>
    %217 = vector.shape_cast %216 : vector<1x4x32xf32> to vector<4x32xf32>
    %218 = vector.shape_cast %214 : vector<4x32xf32> to vector<1x4x32xf32>
    tpu.vector_store %arg9[%215, %c0_79, %c0_80], %218 {strides = array<i32>} : memref<8x4x32xf32, #tpu.memory_space<vmem>>, vector<1x4x32xf32>,
    %c8_i32 = arith.constant 8 : i32
    %c0_81 = arith.constant 0 : index
    %c0_82 = arith.constant 0 : index
    %219 = vector.load %arg10[%c0_81, %c0_82] : memref<4x32xf32, #tpu.memory_space<vmem>>, vector<4x32xf32>
    tpu.vector_store %arg10[%c0_81, %c0_82], %214 {strides = array<i32>} : memref<4x32xf32, #tpu.memory_space<vmem>>, vector<4x32xf32>,
    %c0_83 = arith.constant 0 : index
    %c0_84 = arith.constant 0 : index
    %220 = vector.load %arg11[%c0_83, %c0_84] : memref<4x32xf32, #tpu.memory_space<vmem>>, vector<4x32xf32>
    tpu.vector_store %arg11[%c0_83, %c0_84], %212 {strides = array<i32>} : memref<4x32xf32, #tpu.memory_space<vmem>>, vector<4x32xf32>,
    return
  }
  func.func @transform_0(%arg0: i32) -> (i32, i32) {
    %c0_i32 = arith.constant 0 : i32
    %c0_i32_0 = arith.constant 0 : i32
    %c0_i32_1 = arith.constant 0 : i32
    return %c0_i32, %c0_i32_0 : i32, i32
  }
  func.func @transform_1(%arg0: i32) -> (i32, i32) {
    %c0_i32 = arith.constant 0 : i32
    %c0_i32_0 = arith.constant 0 : i32
    %c0_i32_1 = arith.constant 0 : i32
    return %c0_i32, %c0_i32_0 : i32, i32
  }
  func.func @transform_2(%arg0: i32) -> (i32, i32) {
    %c0_i32 = arith.constant 0 : i32
    %c0_i32_0 = arith.constant 0 : i32
    %c0_i32_1 = arith.constant 0 : i32
    return %c0_i32, %c0_i32_0 : i32, i32
  }
  func.func @transform_3(%arg0: i32) -> (i32, i32) {
    %c0_i32 = arith.constant 0 : i32
    %c0_i32_0 = arith.constant 0 : i32
    %c0_i32_1 = arith.constant 0 : i32
    return %c0_i32, %c0_i32_0 : i32, i32
  }
  func.func @transform_4(%arg0: i32) -> (i32, i32) {
    %c0_i32 = arith.constant 0 : i32
    %c0_i32_0 = arith.constant 0 : i32
    %c0_i32_1 = arith.constant 0 : i32
    return %c0_i32, %c0_i32_0 : i32, i32
  }
  func.func @transform_5(%arg0: i32) -> (i32, i32) {
    %c0_i32 = arith.constant 0 : i32
    %c0_i32_0 = arith.constant 0 : i32
    %c0_i32_1 = arith.constant 0 : i32
    return %c0_i32, %c0_i32_0 : i32, i32
  }
  func.func @transform_6(%arg0: i32) -> (i32, i32) {
    %c0_i32 = arith.constant 0 : i32
    %c0_i32_0 = arith.constant 0 : i32
    %c0_i32_1 = arith.constant 0 : i32
    return %c0_i32, %c0_i32_0 : i32, i32
  }
  func.func @transform_7(%arg0: i32) -> (i32, i32) {
    %c0_i32 = arith.constant 0 : i32
    %c0_i32_0 = arith.constant 0 : i32
    %c0_i32_1 = arith.constant 0 : i32
    return %c0_i32, %c0_i32_0 : i32, i32
  }
  func.func @transform_8(%arg0: i32) -> (i32, i32, i32) {
    %c0_i32 = arith.constant 0 : i32
    %c0_i32_0 = arith.constant 0 : i32
    %c0_i32_1 = arith.constant 0 : i32
    %c0_i32_2 = arith.constant 0 : i32
    return %c0_i32, %c0_i32_0, %c0_i32_1 : i32, i32, i32
  }
  func.func @transform_9(%arg0: i32) -> (i32, i32) {
    %c0_i32 = arith.constant 0 : i32
    %c0_i32_0 = arith.constant 0 : i32
    %c0_i32_1 = arith.constant 0 : i32
    return %c0_i32, %c0_i32_0 : i32, i32
  }
  func.func @transform_10(%arg0: i32) -> (i32, i32) {
    %c0_i32 = arith.constant 0 : i32
    %c0_i32_0 = arith.constant 0 : i32
    %c0_i32_1 = arith.constant 0 : i32
    return %c0_i32, %c0_i32_0 : i32, i32
  }
}

</mosaic_0001>

<bundles_post_ra>
// kernel: tpu_custom_call.1
= control target key start
LH: loop header
LB: loop body
LE: loop exit
PB: predicated region body
PF: predicated region fallthrough
CT: control target
= control target key end

     0   :  { %16 = vsyncpa [#allocation4], 0  ;;  %vm46_vm0 = vcmask 130048   ;;  %s1373_s0 = inlined_call_operand.vmem [shape: f32[32,48], index: 0, kind: input, shape index: {}]   ;;  %s1374_s1 = inlined_call_operand.vmem [shape: f32[64,24], index: 1, kind: input, shape index: {}]   ;;  %s1375_s2 = inlined_call_operand.vmem [shape: f32[64,128], index: 2, kind: input, shape index: {}]   ;;  %s1376_s3 = inlined_call_operand.vmem [shape: f32[48,24], index: 3, kind: input, shape index: {}]   ;;  %s1377_s4 = inlined_call_operand.vmem [shape: f32[64,16], index: 4, kind: input, shape index: {}]   ;;  %s1378_s5 = inlined_call_operand.vmem [shape: f32[64,128], index: 5, kind: input, shape index: {}]   ;;  %s1379_s6 = inlined_call_operand.vmem [shape: f32[32,16], index: 6, kind: input, shape index: {}]   ;;  %s1380_s7 = inlined_call_operand.vmem [shape: f32[1,128], index: 7, kind: input, shape index: {}]   ;;  %s1381_s8 = inlined_call_operand.hbm [shape: f32[8,4,32], index: 8, kind: output, shape index: {0}]   ;;  %s1382_s9 = inlined_call_operand.hbm [shape: f32[4,32], index: 9, kind: output, shape index: {1}]   ;;  %s1383_s10 = inlined_call_operand.hbm [shape: f32[4,32], index: 10, kind: output, shape index: {2}]  }
   0x1   :  { %v45_v0 = vld [vmem:[%s1377_s4 + $0x38] sm:$0xff]  ;;  %v44_v1 = vld [vmem:[%s1377_s4 + $0x30] sm:$0xff]  ;;  %v177_v2 = vld [vmem:[%s1376_s3 + $0x28] sm:$0xff] }
   0x2   :  { %843 = vmatpush.xpose.msk.msra.mxu0 %vm46_vm0, %v45_v0  ;;  %v176_v3 = vld [vmem:[%s1376_s3 + $0x20] sm:$0xff]  ;;  %201 = vmatpush.msra.mxu2 %v177_v2  ;;  %v175_v4 = vld [vmem:[%s1376_s3 + $0x18] sm:$0xff] }
   0x4   :  { %202 = vmatpush.msra.mxu2 %v176_v3 }
   0x6   :  { %844 = vmatpush.xpose.msk.msra.mxu0 %vm46_vm0, %v44_v1 }
   0x7   :  { %17 = vsyncpa [#allocation6], 0  ;;  %v43_v5 = vld [vmem:[%s1377_s4 + $0x28] sm:$0xff]  ;;  %v174_v6 = vld [vmem:[%s1376_s3 + $0x10] sm:$0xff]  ;;  %203 = vmatpush.msra.mxu2 %v175_v4  ;;  %vm178_vm1 = vcmask 392192   ;;  %vm228_vm2 = vcmask 195584   ;;  %v162_v59 = vlaneseq }
   0x8   :  { %v173_v7 = vld [vmem:[%s1376_s3 + $0x8] sm:$0xff]  ;;  %v42_v8 = vld [vmem:[%s1377_s4 + $0x20] sm:$0xff]  ;;  %v41_v11 = vld [vmem:[%s1377_s4 + $0x18] sm:$0xff]  ;;  %vm120_vm3 = vcmask 523264   ;;  %v1003_v57 = vmov 0.0   ;;  %v1004_v63 = vmov 0.5  }
   0x9   :  { %204 = vmatpush.msra.mxu2 %v174_v6  ;;  %v172_v9 = vld [vmem:[%s1376_s3] sm:$0xff]  ;;  %v40_v12 = vld [vmem:[%s1377_s4 + $0x10] sm:$0xff]  ;;  %v39_v13 = vld [vmem:[%s1377_s4 + $0x8] sm:$0xff]  ;;  %v1274_v61 = vand.u32 127, %v162_v59  ;;  %s1006_s16 = smov 96   ;;  %s1007_s17 = smov 64  }
   0xa   :  { %845 = vmatpush.xpose.msk.msra.mxu0 %vm46_vm0, %v43_v5  ;;  %v168_v10 = vld [vmem:[%s1373_s0] sm:$0xff]  ;;  %v227_v14 = vld [vmem:[%s1374_s1 + $0x38] sm:$0xff]  ;;  %v118_v16 = vld [vmem:[%s1378_s5 + $0x30] sm:$0xff]  ;;  %vm401_vm5 = vcmask 257024   ;;  %vm351_vm6 = vcmask 261120   ;;  %s800_s3 = sshll.u32 %s1381_s8, 4  ;;  %s801_s3 = int_to_ptr.hbm [resolvable:$true] %s800_s3 }
   0xb   :  { %205 = vmatpush.msra.mxu2 %v173_v7  ;;  %v119_v15 = vld [vmem:[%s1378_s5 + $0x38] sm:$0xff]  ;;  %863 = vmatpush.xpose.msk.msra.mxu3 %vm228_vm2, %v227_v14  ;;  %v38_v17 = vld [vmem:[%s1377_s4] sm:$0xff]  ;;  %v226_v18 = vld [vmem:[%s1374_s1 + $0x30] sm:$0xff]  ;;  %vm165_vm4 = vcmp.lt.s32.totalorder %v1274_v61, 32  ;;  %s1009_s19 = smov [#allocation3]   ;;  %s814_s23 = sshll.u32 %s1382_s9, 4  ;;  %s815_s23 = int_to_ptr.hbm [resolvable:$true] %s814_s23 }
   0xc   :  { %141 = vmatpush.msra.mxu1 %v119_v15  ;;  %v117_v19 = vld [vmem:[%s1378_s5 + $0x28] sm:$0xff]  ;;  %v34_v20 = vld [vmem:[%s1379_s6] sm:$0xff]  ;;  %v115_v23 = vld [vmem:[%s1378_s5 + $0x18] sm:$0xff]  ;;  %v166_v0 = vsel %vm165_vm4, 1.0, %v1004_v63  ;;  %s798_s20 = sshll.u32 %s1009_s19, 4  ;;  %s1010_s24 = smov [#allocation7]   ;;  %s799_s20 = int_to_ptr.vmem [resolvable:$true] %s798_s20 }
   0xd   :  { %206 = vmatpush.msra.mxu2 %v172_v9  ;;  %v116_v21 = vld [vmem:[%s1378_s5 + $0x20] sm:$0xff]  ;;  %v225_v22 = vld [vmem:[%s1374_s1 + $0x28] sm:$0xff]  ;;  %v114_v24 = vld [vmem:[%s1378_s5 + $0x10] sm:$0xff]  ;;  %s823_s25 = sshll.u32 %s1010_s24, 4  ;;  %s825_s28 = sshll.u32 %s1383_s10, 4  ;;  %s824_s25 = int_to_ptr.vmem [resolvable:$true] %s823_s25  ;;  %s826_s28 = int_to_ptr.hbm [resolvable:$true] %s825_s28 }
   0xe   :  { %846 = vmatpush.xpose.msk.msra.mxu0 %vm46_vm0, %v42_v8  ;;  %859 = vmatmul.msk.f32.vlgmr.msra.gmra.mxu2 %vm178_vm1, %v168_v10  ;;  %v224_v25 = vld [vmem:[%s1374_s1 + $0x20] sm:$0xff]  ;;  %v113_v26 = vld [vmem:[%s1378_s5 + $0x8] sm:$0xff]  ;;  %v223_v28 = vld [vmem:[%s1374_s1 + $0x18] sm:$0xff]  ;;  %s1011_s8 = smov 4  }
   0xf   :  { %142 = vmatpush.msra.mxu1 %v118_v16  ;;  %864 = vmatpush.xpose.msk.msra.mxu3 %vm228_vm2, %v226_v18  ;;  %v35_v27 = vld [vmem:[%s1379_s6 + $0x8] sm:$0xff]  ;;  %v222_v29 = vld [vmem:[%s1374_s1 + $0x10] sm:$0xff]  ;;  %v37_v31 = vld [vmem:[%s1379_s6 + $0x18] sm:$0xff] }
  0x10   :  { %v36_v30 = vld [vmem:[%s1379_s6 + $0x10] sm:$0xff]  ;;  %v112_v32 = vld [vmem:[%s1378_s5] sm:$0xff]  ;;  %v221_v33 = vld [vmem:[%s1374_s1 + $0x8] sm:$0xff] }
  0x11   :  { %143 = vmatpush.msra.mxu1 %v117_v19  ;;  %v220_v34 = vld [vmem:[%s1374_s1] sm:$0xff]  ;;  %v169_v36 = vld [vmem:[%s1373_s0 + $0x8] sm:$0xff]  ;;  %v170_v41 = vld [vmem:[%s1373_s0 + $0x10] sm:$0xff]  ;;  %s1008_s1 = smov [#allocation5]  }
  0x12   :  { %847 = vmatpush.xpose.msk.msra.mxu0 %vm46_vm0, %v41_v11  ;;  %v301_v42 = vld [vmem:[%s1375_s2 + $0x38] sm:$0xff]  ;;  %v300_v43 = vld [vmem:[%s1375_s2 + $0x30] sm:$0xff]  ;;  %v299_v44 = vld [vmem:[%s1375_s2 + $0x28] sm:$0xff]  ;;  %s812_s5 = sshll.u32 %s1008_s1, 4  ;;  %s813_s5 = int_to_ptr.vmem [resolvable:$true] %s812_s5 }
  0x13   :  { %144 = vmatpush.msra.mxu1 %v116_v21  ;;  %865 = vmatpush.xpose.msk.msra.mxu3 %vm228_vm2, %v225_v22  ;;  %v298_v45 = vld [vmem:[%s1375_s2 + $0x20] sm:$0xff]  ;;  %v171_v46 = vld [vmem:[%s1373_s0 + $0x18] sm:$0xff]  ;;  %v296_v48 = vld [vmem:[%s1375_s2 + $0x10] sm:$0xff] }
  0x14   :  { %325 = vmatpush.msrb.mxu2 %v301_v42  ;;  %v297_v47 = vld [vmem:[%s1375_s2 + $0x18] sm:$0xff]  ;;  %v295_v49 = vld [vmem:[%s1375_s2 + $0x8] sm:$0xff]  ;;  %v294_v50 = vld [vmem:[%s1375_s2] sm:$0xff] }
  0x15   :  { %145 = vmatpush.msra.mxu1 %v115_v23  ;;  %v164_v62 = vld [vmem:[%s1380_s7] sm:$0x1]  ;;  %s1005_s7 = smov 32  }
  0x16   :  { %848 = vmatpush.xpose.msk.msra.mxu0 %vm46_vm0, %v40_v12  ;;  %860 = vmatmul.msk.f32.gmra.mxu2 %vm178_vm1, %v169_v36  ;;  %v167_v1 = vmul.f32 %v166_v0, %v164_v62 }
  0x17   :  { %146 = vmatpush.msra.mxu1 %v114_v24  ;;  %866 = vmatpush.xpose.msk.msra.mxu3 %vm228_vm2, %v224_v25 }
  0x18   :  { %326 = vmatpush.msrb.mxu2 %v300_v43  ;;  %v303_v2 = vperm.slane %v167_v1, 0 }
  0x19   :  { %147 = vmatpush.msra.mxu1 %v113_v26 }
  0x1a   :  { %849 = vmatpush.xpose.msk.msra.mxu0 %vm46_vm0, %v39_v13  ;;  %327 = vmatpush.msrb.mxu2 %v299_v44 }
  0x1b   :  { %867 = vmatpush.xpose.msk.msra.mxu3 %vm228_vm2, %v223_v28  ;;  %148 = vmatpush.msra.mxu1 %v112_v32 }
  0x1c   :  { %328 = vmatpush.msrb.mxu2 %v298_v45 }
  0x1e   :  { %850 = vmatpush.xpose.msk.msra.mxu0 %vm46_vm0, %v38_v17  ;;  %861 = vmatmul.msk.f32.gmra.mxu2 %vm178_vm1, %v170_v41 }
  0x1f   :  { %868 = vmatpush.xpose.msk.msra.mxu3 %vm228_vm2, %v222_v29  ;;  %329 = vmatpush.msrb.mxu2 %v297_v47 }
  0x21   :  { %851 = vmatmul.msk.f32.vlgmr.msra.gmra.mxu0 %vm46_vm0, %v34_v20  ;;  %330 = vmatpush.msrb.mxu2 %v296_v48 }
  0x23   :  { %869 = vmatpush.xpose.msk.msra.mxu3 %vm228_vm2, %v221_v33  ;;  %331 = vmatpush.msrb.mxu2 %v295_v49 }
  0x25   :  { %332 = vmatpush.msrb.mxu2 %v294_v50 }
  0x26   :  { %862 = vmatmul.msk.f32.gmra.mxu2 %vm178_vm1, %v171_v46 }
  0x27   :  { %870 = vmatpush.xpose.msk.msra.mxu3 %vm228_vm2, %v220_v34 }
  0x29   :  { %852 = vmatmul.msk.f32.gmra.mxu0 %vm46_vm0, %v35_v27 }
  0x31   :  { %853 = vmatmul.msk.f32.gmra.mxu0 %vm46_vm0, %v36_v30 }
  0x39   :  { %854 = vmatmul.msk.f32.gmra.mxu0 %vm46_vm0, %v37_v31 }
  0x91   :  { %v208_v35 = vpop.f32.mrf.mxu2 }
  0x92   :  { %871 = vmatmul.msk.f32.vlgmr.msra.gmra.mxu3 %vm228_vm2, %v208_v35 }
  0x99   :  { %v211_v54 = vpop.f32.mrf.mxu2 }
  0x9a   :  { %872 = vmatmul.msk.f32.gmra.mxu3 %vm228_vm2, %v211_v54 }
  0x9e   :  { %v100_v37 = vpop.f32.mrf.mxu0 }
  0x9f   :  { %855 = vmatmul.msk.f32.vlgmr.msra.gmra.mxu1 %vm120_vm3, %v100_v37 }
  0xa1   :  { %v214_v58 = vpop.f32.mrf.mxu2 }
  0xa2   :  { %873 = vmatmul.msk.f32.gmra.mxu3 %vm228_vm2, %v214_v58 }
  0xa6   :  { %v103_v38 = vpop.f32.mrf.mxu0 }
  0xa7   :  { %856 = vmatmul.msk.f32.gmra.mxu1 %vm120_vm3, %v103_v38 }
  0xa9   :  { %v217_v60 = vpop.f32.mrf.mxu2 }
  0xaa   :  { %874 = vmatmul.msk.f32.gmra.mxu3 %vm228_vm2, %v217_v60 }
  0xae   :  { %v106_v39 = vpop.f32.mrf.mxu0 }
  0xaf   :  { %857 = vmatmul.msk.f32.gmra.mxu1 %vm120_vm3, %v106_v39 }
  0xb6   :  { %v109_v40 = vpop.f32.mrf.mxu0 }
  0xb7   :  { %858 = vmatmul.msk.f32.gmra.mxu1 %vm120_vm3, %v109_v40 }
 0x115   :  { %v282_v51 = vpop.f32.mrf.mxu3 }
 0x116   :  { %875 = vmatmul.msk.f32.vlgmr.msrb.gmra.mxu2 %vm120_vm3, %v282_v51 }
 0x11c   :  { %v1235_v52 = vpop.f32.mrf.mxu1 }
 0x11d   :  { %v285_v5 = vpop.f32.mrf.mxu3 }
 0x11e   :  { %876 = vmatmul.msk.f32.gmra.mxu2 %vm120_vm3, %v285_v5 }
 0x124   :  { %v1237_v53 = vpop.f32.mrf.mxu1 }
 0x125   :  { %v288_v14 = vpop.f32.mrf.mxu3 }
 0x126   :  { %877 = vmatmul.msk.f32.gmra.mxu2 %vm120_vm3, %v288_v14 }
 0x12c   :  { %v1240_v55 = vpop.f32.mrf.mxu1 }
 0x12d   :  { %v291_v15 = vpop.f32.mrf.mxu3 }
 0x12e   :  { %878 = vmatmul.msk.f32.gmra.mxu2 %vm120_vm3, %v291_v15 }
 0x134   :  { %v1242_v56 = vpop.f32.mrf.mxu1 }
 0x135   :  { %367 = vmatpush.msrb.mxu1 %v1242_v56  ;;  %473 = vmatpush.msrb.mxu0 %v1242_v56 }
 0x136   :  { %583 = vmatpush.msrb.mxu3 %v1242_v56 }
 0x137   :  { %368 = vmatpush.msrb.mxu1 %v1240_v55  ;;  %474 = vmatpush.msrb.mxu0 %v1240_v55 }
 0x138   :  { %584 = vmatpush.msrb.mxu3 %v1240_v55 }
 0x139   :  { %369 = vmatpush.msrb.mxu1 %v1237_v53  ;;  %475 = vmatpush.msrb.mxu0 %v1237_v53 }
 0x13a   :  { %585 = vmatpush.msrb.mxu3 %v1237_v53 }
 0x13b   :  { %370 = vmatpush.msrb.mxu1 %v1235_v52  ;;  %476 = vmatpush.msrb.mxu0 %v1235_v52 }
 0x13c   :  { %586 = vmatpush.msrb.mxu3 %v1235_v52  ;;  %371 = vmatmul.f32.vlgmr.msrb.gmra.mxu1 %v1003_v57 }
 0x13d   :  { %418 = vmatpush.msra.mxu1 %v1242_v56  ;;  %638 = vmatpush.msra.mxu0 %v1242_v56 }
 0x13e   :  { %748 = vmatpush.msra.mxu3 %v1242_v56 }
 0x13f   :  { %419 = vmatpush.msra.mxu1 %v1240_v55  ;;  %639 = vmatpush.msra.mxu0 %v1240_v55 }
 0x140   :  { %749 = vmatpush.msra.mxu3 %v1240_v55 }
 0x141   :  { %420 = vmatpush.msra.mxu1 %v1237_v53  ;;  %640 = vmatpush.msra.mxu0 %v1237_v53 }
 0x142   :  { %750 = vmatpush.msra.mxu3 %v1237_v53 }
 0x143   :  { %421 = vmatpush.msra.mxu1 %v1235_v52  ;;  %641 = vmatpush.msra.mxu0 %v1235_v52 }
 0x144   :  { %751 = vmatpush.msra.mxu3 %v1235_v52 }
 0x145   :  { %528 = vmatpush.msrb.mxu1 %v1242_v56 }
 0x147   :  { %529 = vmatpush.msrb.mxu1 %v1240_v55 }
 0x149   :  { %530 = vmatpush.msrb.mxu1 %v1237_v53 }
 0x14b   :  { %531 = vmatpush.msrb.mxu1 %v1235_v52 }
 0x199   :  { %v334_v3 = vpop.f32.mrf.mxu2 }
 0x19a   :  { %v335_v4 = vadd.f32 %v334_v3, %v303_v2 }
 0x19c   :  { %346 = vst [vmem:[#allocation2] sm:$0xff] %v335_v4 }
 0x1a1   :  { %v337_v21 = vpop.f32.mrf.mxu2 }
 0x1a2   :  { %v338_v22 = vadd.f32 %v337_v21, %v303_v2 }
 0x1a3   :  { %v350_v6 = vld [vmem:[#allocation2] sm:$0xf]  ;;  %v403_v30 = vld [vmem:[#allocation2 + $0x4] sm:$0xf] }
 0x1a4   :  { %347 = vst [vmem:[#allocation2 + $0x8] sm:$0xff] %v338_v22 }
 0x1a9   :  { %v340_v23 = vpop.f32.mrf.mxu2 }
 0x1aa   :  { %v341_v24 = vadd.f32 %v340_v23, %v303_v2 }
 0x1ab   :  { %v458_v47 = vld [vmem:[#allocation2 + $0x8] sm:$0xf]  ;;  %v513_v1 = vld [vmem:[#allocation2 + $0xc] sm:$0xf] }
 0x1ac   :  { %348 = vst [vmem:[#allocation2 + $0x10] sm:$0xff] %v341_v24 }
 0x1b1   :  { %v343_v25 = vpop.f32.mrf.mxu2 }
 0x1b2   :  { %v344_v26 = vadd.f32 %v343_v25, %v303_v2 }
 0x1b4   :  { %349 = vst [vmem:[#allocation2 + $0x18] sm:$0xff] %v344_v26 }
 0x1b9   :  { %v372_v7 = vpop.f32.mrf.mxu1 }
 0x1ba   :  { %v375_v8 = vadd.f32 %v372_v7, %v350_v6 }
 0x1bc   :  { %895 = vtanh.f32 %v375_v8 }
 0x1c2   :  { %v896_v9 = vpop.eup %895 }
 0x1c3   :  { %v377_v10 = vmul.f32 0.5, %v896_v9 }
 0x1c5   :  { %v378_v11 = vadd.f32 0.5, %v377_v10 }
 0x1c7   :  { %v379_v12 = vsel %vm165_vm4, %v896_v9, %v378_v11 }
 0x1c8   :  { %381 = vrot.lane.b32.xlu0 %v379_v12, %s1005_s7  ;;  %v385_v13 = vmul.f32 0.0, %v379_v12 }
 0x1d0   :  { %387 = vrot.lane.b32.xlu0 %v385_v13, %s1006_s16 }
 0x23a   :  { %v382_v16 = vpop.permute.xlu0 %381 }
 0x23b   :  { %v384_v17 = vmul.f32 %v382_v16, %v379_v12 }
 0x242   :  { %v388_v18 = vpop.permute.xlu0 %387 }
 0x243   :  { %v390_v19 = vadd.f32 %v388_v18, %v384_v17  ;;  %v568_v18 = vld [vmem:[#allocation2 + $0x10] sm:$0xf] }
 0x245   :  { %897 = vtanh.f32 %v390_v19  ;;  %437 = vrot.lane.b32.xlu2 %v390_v19, %s1005_s7 }
 0x24b   :  { %v898_v20 = vpop.eup %897 }
 0x24c   :  { %393 = vrot.lane.b32.xlu1 %v898_v20, %s1007_s17 }
 0x29f   :  { %v438_v36 = vpop.permute.xlu2 %437 }
 0x2be   :  { %v394_v27 = vpop.permute.xlu1 %393 }
 0x2bf   :  { %v396_v28 = vmul.f32 %v394_v27, %v379_v12 }
 0x2c1   :  { %398 = vrot.lane.b32.xlu1 %v396_v28, %s1005_s7 }
 0x333   :  { %v399_v29 = vpop.permute.xlu1 %398 }
 0x334   :  { %402 = vst.msk [vmem:[#allocation3] sm:$0xf] %vm401_vm5, %v399_v29  ;;  %879 = vmatmul.msk.f32.vlgmr.msra.gmra.mxu1 %vm351_vm6, %v399_v29 }
 0x335   :  { %693 = vmatpush.msra.mxu1 %v1242_v56 }
 0x337   :  { %694 = vmatpush.msra.mxu1 %v1240_v55 }
 0x339   :  { %695 = vmatpush.msra.mxu1 %v1237_v53 }
 0x33b   :  { %696 = vmatpush.msra.mxu1 %v1235_v52 }
 0x3b1   :  { %v423_v31 = vpop.f32.mrf.mxu1 }
 0x3b2   :  { %v426_v32 = vadd.f32 %v423_v31, %v403_v30 }
 0x3b4   :  { %899 = vtanh.f32 %v426_v32 }
 0x3ba   :  { %v900_v33 = vpop.eup %899 }
 0x3bb   :  { %v428_v34 = vmul.f32 0.5, %v900_v33 }
 0x3bd   :  { %v429_v35 = vadd.f32 0.5, %v428_v34 }
 0x3bf   :  { %v430_v37 = vsel %vm165_vm4, %v900_v33, %v429_v35  ;;  %v623_v35 = vld [vmem:[#allocation2 + $0x14] sm:$0xf] }
 0x3c0   :  { %432 = vrot.lane.b32.xlu2 %v430_v37, %s1005_s7  ;;  %v440_v38 = vmul.f32 %v438_v36, %v430_v37 }
 0x3c2   :  { %442 = vrot.lane.b32.xlu0 %v440_v38, %s1006_s16 }
 0x41a   :  { %v433_v39 = vpop.permute.xlu2 %432 }
 0x41b   :  { %v435_v40 = vmul.f32 %v433_v39, %v430_v37 }
 0x434   :  { %v443_v41 = vpop.permute.xlu0 %442 }
 0x435   :  { %v445_v42 = vadd.f32 %v443_v41, %v435_v40 }
 0x437   :  { %901 = vtanh.f32 %v445_v42  ;;  %492 = vrot.lane.b32.xlu0 %v445_v42, %s1005_s7 }
 0x43d   :  { %v902_v43 = vpop.eup %901 }
 0x43e   :  { %448 = vrot.lane.b32.xlu1 %v902_v43, %s1007_s17 }
 0x4a9   :  { %v493_v53 = vpop.permute.xlu0 %492 }
 0x4b0   :  { %v449_v44 = vpop.permute.xlu1 %448 }
 0x4b1   :  { %v451_v45 = vmul.f32 %v449_v44, %v430_v37 }
 0x4b3   :  { %453 = vrot.lane.b32.xlu2 %v451_v45, %s1005_s7 }
 0x50d   :  { %v454_v46 = vpop.permute.xlu2 %453 }
 0x50e   :  { %457 = vst.msk [vmem:[#allocation3 + $0x4] sm:$0xf] %vm401_vm5, %v454_v46  ;;  %880 = vmatmul.msk.f32.vlgmr.msrb.gmra.mxu0 %vm351_vm6, %v454_v46 }
 0x58b   :  { %v478_v48 = vpop.f32.mrf.mxu0 }
 0x58c   :  { %v481_v49 = vadd.f32 %v478_v48, %v458_v47 }
 0x58e   :  { %903 = vtanh.f32 %v481_v49 }
 0x594   :  { %v904_v50 = vpop.eup %903 }
 0x595   :  { %v483_v51 = vmul.f32 0.5, %v904_v50 }
 0x597   :  { %v484_v52 = vadd.f32 0.5, %v483_v51 }
 0x599   :  { %v485_v54 = vsel %vm165_vm4, %v904_v50, %v484_v52  ;;  %v678_v52 = vld [vmem:[#allocation2 + $0x18] sm:$0xf] }
 0x59a   :  { %487 = vrot.lane.b32.xlu1 %v485_v54, %s1005_s7  ;;  %v495_v55 = vmul.f32 %v493_v53, %v485_v54 }
 0x59c   :  { %497 = vrot.lane.b32.xlu2 %v495_v55, %s1006_s16 }
 0x5f6   :  { %v498_v58 = vpop.permute.xlu2 %497 }
 0x60c   :  { %v488_v56 = vpop.permute.xlu1 %487 }
 0x60d   :  { %v490_v57 = vmul.f32 %v488_v56, %v485_v54 }
 0x60f   :  { %v500_v59 = vadd.f32 %v498_v58, %v490_v57 }
 0x611   :  { %905 = vtanh.f32 %v500_v59  ;;  %547 = vrot.lane.b32.xlu2 %v500_v59, %s1005_s7 }
 0x617   :  { %v906_v60 = vpop.eup %905 }
 0x618   :  { %503 = vrot.lane.b32.xlu0 %v906_v60, %s1007_s17 }
 0x66b   :  { %v548_v7 = vpop.permute.xlu2 %547 }
 0x68a   :  { %v504_v62 = vpop.permute.xlu0 %503 }
 0x68b   :  { %v506_v63 = vmul.f32 %v504_v62, %v485_v54 }
 0x68d   :  { %508 = vrot.lane.b32.xlu1 %v506_v63, %s1005_s7 }
 0x6ff   :  { %v509_v0 = vpop.permute.xlu1 %508 }
 0x700   :  { %512 = vst.msk [vmem:[#allocation3 + $0x8] sm:$0xf] %vm401_vm5, %v509_v0  ;;  %881 = vmatmul.msk.f32.vlgmr.msrb.gmra.mxu1 %vm351_vm6, %v509_v0 }
 0x77d   :  { %v533_v2 = vpop.f32.mrf.mxu1 }
 0x77e   :  { %v536_v3 = vadd.f32 %v533_v2, %v513_v1 }
 0x780   :  { %907 = vtanh.f32 %v536_v3 }
 0x786   :  { %v908_v4 = vpop.eup %907 }
 0x787   :  { %v538_v5 = vmul.f32 0.5, %v908_v4 }
 0x789   :  { %v539_v6 = vadd.f32 0.5, %v538_v5 }
 0x78b   :  { %v540_v8 = vsel %vm165_vm4, %v908_v4, %v539_v6  ;;  %v733_v6 = vld [vmem:[#allocation2 + $0x1c] sm:$0xf] }
 0x78c   :  { %542 = vrot.lane.b32.xlu0 %v540_v8, %s1005_s7  ;;  %v550_v9 = vmul.f32 %v548_v7, %v540_v8 }
 0x78e   :  { %552 = vrot.lane.b32.xlu1 %v550_v9, %s1006_s16 }
 0x7fe   :  { %v543_v10 = vpop.permute.xlu0 %542 }
 0x7ff   :  { %v545_v11 = vmul.f32 %v543_v10, %v540_v8 }
 0x800   :  { %v553_v12 = vpop.permute.xlu1 %552 }
 0x801   :  { %v555_v13 = vadd.f32 %v553_v12, %v545_v11 }
 0x803   :  { %909 = vtanh.f32 %v555_v13  ;;  %602 = vrot.lane.b32.xlu1 %v555_v13, %s1005_s7 }
 0x809   :  { %v910_v14 = vpop.eup %909 }
 0x80a   :  { %558 = vrot.lane.b32.xlu2 %v910_v14, %s1007_s17 }
 0x864   :  { %v559_v15 = vpop.permute.xlu2 %558 }
 0x865   :  { %v561_v16 = vmul.f32 %v559_v15, %v540_v8 }
 0x867   :  { %563 = vrot.lane.b32.xlu0 %v561_v16, %s1005_s7 }
 0x875   :  { %v603_v24 = vpop.permute.xlu1 %602 }
 0x8d9   :  { %v564_v17 = vpop.permute.xlu0 %563 }
 0x8da   :  { %567 = vst.msk [vmem:[#allocation3 + $0xc] sm:$0xf] %vm401_vm5, %v564_v17  ;;  %882 = vmatmul.msk.f32.vlgmr.msrb.gmra.mxu3 %vm351_vm6, %v564_v17 }
 0x95d   :  { %v588_v19 = vpop.f32.mrf.mxu3 }
 0x95e   :  { %v591_v20 = vadd.f32 %v588_v19, %v568_v18 }
 0x960   :  { %911 = vtanh.f32 %v591_v20 }
 0x966   :  { %v912_v21 = vpop.eup %911 }
 0x967   :  { %v593_v22 = vmul.f32 0.5, %v912_v21 }
 0x969   :  { %v594_v23 = vadd.f32 0.5, %v593_v22 }
 0x96b   :  { %v595_v25 = vsel %vm165_vm4, %v912_v21, %v594_v23 }
 0x96c   :  { %597 = vrot.lane.b32.xlu2 %v595_v25, %s1005_s7  ;;  %v605_v26 = vmul.f32 %v603_v24, %v595_v25 }
 0x96e   :  { %607 = vrot.lane.b32.xlu0 %v605_v26, %s1006_s16 }
 0x9c6   :  { %v598_v27 = vpop.permute.xlu2 %597 }
 0x9c7   :  { %v600_v28 = vmul.f32 %v598_v27, %v595_v25 }
 0x9e0   :  { %v608_v29 = vpop.permute.xlu0 %607 }
 0x9e1   :  { %v610_v30 = vadd.f32 %v608_v29, %v600_v28 }
 0x9e3   :  { %913 = vtanh.f32 %v610_v30  ;;  %657 = vrot.lane.b32.xlu0 %v610_v30, %s1005_s7 }
 0x9e9   :  { %v914_v31 = vpop.eup %913 }
 0x9ea   :  { %613 = vrot.lane.b32.xlu1 %v914_v31, %s1007_s17 }
 0xa55   :  { %v658_v41 = vpop.permute.xlu0 %657 }
 0xa5c   :  { %v614_v32 = vpop.permute.xlu1 %613 }
 0xa5d   :  { %v616_v33 = vmul.f32 %v614_v32, %v595_v25 }
 0xa5f   :  { %618 = vrot.lane.b32.xlu2 %v616_v33, %s1005_s7 }
 0xab9   :  { %v619_v34 = vpop.permute.xlu2 %618 }
 0xaba   :  { %622 = vst.msk [vmem:[#allocation3 + $0x10] sm:$0xf] %vm401_vm5, %v619_v34  ;;  %883 = vmatmul.msk.f32.vlgmr.msra.gmra.mxu0 %vm351_vm6, %v619_v34 }
 0xb37   :  { %v643_v36 = vpop.f32.mrf.mxu0 }
 0xb38   :  { %v646_v37 = vadd.f32 %v643_v36, %v623_v35 }
 0xb3a   :  { %915 = vtanh.f32 %v646_v37 }
 0xb40   :  { %v916_v38 = vpop.eup %915 }
 0xb41   :  { %v648_v39 = vmul.f32 0.5, %v916_v38 }
 0xb43   :  { %v649_v40 = vadd.f32 0.5, %v648_v39 }
 0xb45   :  { %v650_v42 = vsel %vm165_vm4, %v916_v38, %v649_v40 }
 0xb46   :  { %652 = vrot.lane.b32.xlu1 %v650_v42, %s1005_s7  ;;  %v660_v43 = vmul.f32 %v658_v41, %v650_v42 }
 0xb48   :  { %662 = vrot.lane.b32.xlu2 %v660_v43, %s1006_s16 }
 0xba2   :  { %v663_v46 = vpop.permute.xlu2 %662 }
 0xbb8   :  { %v653_v44 = vpop.permute.xlu1 %652 }
 0xbb9   :  { %v655_v45 = vmul.f32 %v653_v44, %v650_v42 }
 0xbbb   :  { %v665_v47 = vadd.f32 %v663_v46, %v655_v45 }
 0xbbd   :  { %917 = vtanh.f32 %v665_v47  ;;  %712 = vrot.lane.b32.xlu2 %v665_v47, %s1005_s7 }
 0xbc3   :  { %v918_v48 = vpop.eup %917 }
 0xbc4   :  { %668 = vrot.lane.b32.xlu0 %v918_v48, %s1007_s17 }
 0xc17   :  { %v713_v58 = vpop.permute.xlu2 %712 }
 0xc36   :  { %v669_v49 = vpop.permute.xlu0 %668 }
 0xc37   :  { %v671_v50 = vmul.f32 %v669_v49, %v650_v42 }
 0xc39   :  { %673 = vrot.lane.b32.xlu1 %v671_v50, %s1005_s7 }
 0xcab   :  { %v674_v51 = vpop.permute.xlu1 %673 }
 0xcac   :  { %677 = vst.msk [vmem:[#allocation3 + $0x14] sm:$0xf] %vm401_vm5, %v674_v51  ;;  %884 = vmatmul.msk.f32.vlgmr.msra.gmra.mxu1 %vm351_vm6, %v674_v51 }
 0xd29   :  { %v698_v53 = vpop.f32.mrf.mxu1 }
 0xd2a   :  { %v701_v54 = vadd.f32 %v698_v53, %v678_v52 }
 0xd2c   :  { %919 = vtanh.f32 %v701_v54 }
 0xd32   :  { %v920_v55 = vpop.eup %919 }
 0xd33   :  { %v703_v56 = vmul.f32 0.5, %v920_v55 }
 0xd35   :  { %v704_v57 = vadd.f32 0.5, %v703_v56 }
 0xd37   :  { %v705_v59 = vsel %vm165_vm4, %v920_v55, %v704_v57 }
 0xd38   :  { %707 = vrot.lane.b32.xlu0 %v705_v59, %s1005_s7  ;;  %v715_v60 = vmul.f32 %v713_v58, %v705_v59 }
 0xd3a   :  { %717 = vrot.lane.b32.xlu1 %v715_v60, %s1006_s16 }
 0xdaa   :  { %v708_v62 = vpop.permute.xlu0 %707 }
 0xdab   :  { %v710_v63 = vmul.f32 %v708_v62, %v705_v59 }
 0xdac   :  { %v718_v0 = vpop.permute.xlu1 %717 }
 0xdad   :  { %v720_v1 = vadd.f32 %v718_v0, %v710_v63 }
 0xdaf   :  { %921 = vtanh.f32 %v720_v1  ;;  %767 = vrot.lane.b32.xlu1 %v720_v1, %s1005_s7 }
 0xdb5   :  { %v922_v2 = vpop.eup %921 }
 0xdb6   :  { %723 = vrot.lane.b32.xlu2 %v922_v2, %s1007_s17 }
 0xe10   :  { %v724_v3 = vpop.permute.xlu2 %723 }
 0xe11   :  { %v726_v4 = vmul.f32 %v724_v3, %v705_v59 }
 0xe13   :  { %728 = vrot.lane.b32.xlu0 %v726_v4, %s1005_s7 }
 0xe21   :  { %v768_v12 = vpop.permute.xlu1 %767 }
 0xe85   :  { %v729_v5 = vpop.permute.xlu0 %728 }
 0xe86   :  { %732 = vst.msk [vmem:[#allocation3 + $0x18] sm:$0xf] %vm401_vm5, %v729_v5  ;;  %885 = vmatmul.msk.f32.vlgmr.msra.gmra.mxu3 %vm351_vm6, %v729_v5 }
 0xf09   :  { %v753_v7 = vpop.f32.mrf.mxu3 }
 0xf0a   :  { %v756_v8 = vadd.f32 %v753_v7, %v733_v6 }
 0xf0c   :  { %923 = vtanh.f32 %v756_v8 }
 0xf12   :  { %v924_v9 = vpop.eup %923 }
 0xf13   :  { %v758_v10 = vmul.f32 0.5, %v924_v9 }
 0xf15   :  { %v759_v11 = vadd.f32 0.5, %v758_v10 }
 0xf17   :  { %v760_v13 = vsel %vm165_vm4, %v924_v9, %v759_v11 }
 0xf18   :  { %762 = vrot.lane.b32.xlu2 %v760_v13, %s1005_s7  ;;  %v770_v14 = vmul.f32 %v768_v12, %v760_v13 }
 0xf1a   :  { %772 = vrot.lane.b32.xlu0 %v770_v14, %s1006_s16 }
 0xf72   :  { %v763_v15 = vpop.permute.xlu2 %762 }
 0xf73   :  { %v765_v16 = vmul.f32 %v763_v15, %v760_v13 }
 0xf8c   :  { %v773_v17 = vpop.permute.xlu0 %772 }
 0xf8d   :  { %v775_v18 = vadd.f32 %v773_v17, %v765_v16 }
 0xf8f   :  { %925 = vtanh.f32 %v775_v18  ;;  %790 = vrot.lane.b32.xlu0 %v775_v18, %s1006_s16 }
 0xf95   :  { %v926_v19 = vpop.eup %925 }
 0xf96   :  { %778 = vrot.lane.b32.xlu1 %v926_v19, %s1007_s17 }
0x1001   :  { %v791_v20 = vpop.permute.xlu0 %790 }
0x1002   :  { %793 = vst.msk [vmem:[#allocation7] sm:$0xf] %vm401_vm5, %v791_v20 }
0x1008   :  { %v779_v61 = vpop.permute.xlu1 %778 }
0x1009   :  { %v781_v21 = vmul.f32 %v779_v61, %v760_v13 }
0x100b   :  { %783 = vrot.lane.b32.xlu2 %v781_v21, %s1005_s7 }
0x1065   :  { %v784_v22 = vpop.permute.xlu2 %783 }
0x1066   :  { %787 = vst.msk [vmem:[#allocation3 + $0x1c] sm:$0xf] %vm401_vm5, %v784_v22 }
0x1067   :  { %788 = vst.msk [vmem:[#allocation5] sm:$0xf] %vm401_vm5, %v784_v22  ;;  %806 = dma.vmem_to_hbm [thread:$0]  %s799_s20, 512, %s801_s3, [#allocation4], %s1007_s17, %s1007_s17, %s1011_s8  }
0x1068   :  { %817 = dma.vmem_to_hbm [thread:$0]  %s813_s5, 64, %s815_s23, [#allocation6]  }
0x1069   :  { %828 = dma.vmem_to_hbm [thread:$0]  %s824_s25, 64, %s826_s28, [#allocation6]  }
0x106a   :  { %999 = dma.done.wait [#allocation4], 512  }
0x106b   :  { %1000 = vsyncadd [#allocation4], 4294966784 }
0x106c   :  { %1001 = dma.done.wait [#allocation6], 128  }
0x106d   :  { %1002 = vsyncadd [#allocation6], 4294967168 }
0x106e   :  { %841 = vsyncpa [#allocation4], 1 }
0x106f   :  { %842 = vsyncpa [#allocation6], 1 }

</bundles_post_ra>
